<compile_context>
chip_gen: v7x
topology: tpu7x:2x2x1
jax: 0.10.0
libtpu: 0.0.40
codegen_flags: <defaults>
</compile_context>

<pallas_src>
import jax
import jax.numpy as jnp
from jax.experimental import pallas as pl
from jax.experimental.pallas import tpu as pltpu


def _policy_mlp_kernel(obs_ref, w1_ref, b1_ref, w2_ref, b2_ref, w3_ref, b3_ref,
                       out_ref):
    """Fused 3-layer MLP on one batch tile: relu(relu(x@W1+b1)@W2+b2)@W3+b3."""
    x = obs_ref[...]
    h1 = jnp.dot(x, w1_ref[...], preferred_element_type=jnp.float32) + b1_ref[...]
    h1 = jnp.maximum(h1, 0.0)                        # hidden_activation = relu
    h2 = jnp.dot(h1, w2_ref[...], preferred_element_type=jnp.float32) + b2_ref[...]
    h2 = jnp.maximum(h2, 0.0)                        # hidden_activation = relu
    logits = jnp.dot(h2, w3_ref[...], preferred_element_type=jnp.float32) + b3_ref[...]
    out_ref[...] = logits.astype(out_ref.dtype)      # output_activation = identity


def _round_up(x, m):
    return ((x + m - 1) // m) * m


def stocha_policy_multi_dis_forward(obs, params, *, act_dim, act_num_per_dim,
                                    max_tile_b=4096):
    """Fused MLP via pallas_call; returns logits reshaped to (B, act_dim, act_num_per_dim)."""
    w1, b1, w2, b2, w3, b3 = params
    B, obs_dim = obs.shape
    h1_dim, h2_dim, out_features = w1.shape[1], w2.shape[1], w3.shape[1]

    # The PyTorch module implicitly assumes a uniform multi-discrete act_shape;
    # make that assumption explicit.
    assert act_dim * act_num_per_dim == out_features, (
        "act_shape must be uniform: act_dim * act_num_per_dim must equal the MLP "
        "output width")

    # Batch tile: as large as possible (amortizes the fixed per-grid-step cost), a
    # multiple of 8 sublanes, but capped near B/2 so the 'parallel' batch axis has at
    # least two steps for v7x's two TensorCores whenever B allows it.
    tile_b = max(8, min(max_tile_b, _round_up(pl.cdiv(B, 2), 8)))
    grid = (pl.cdiv(B, tile_b),)   # ragged last block: Pallas masks its writeback

    param_bytes = sum(int(p.size) * p.dtype.itemsize for p in params)

    # Advisory cost hint for XLA's scheduler around the custom call.
    cost = pl.CostEstimate(
        flops=2 * B * (obs_dim * h1_dim + h1_dim * h2_dim + h2_dim * out_features),
        transcendentals=0,
        bytes_accessed=4 * B * (obs_dim + out_features) + param_bytes,
    )

    # Scoped-VMEM need: double-buffered obs/out tiles + intermediates + weights.
    # Stays far below the 16 MiB v5e default at max_tile_b <= 8192; only raise the
    # limit if a user-requested giant tile would exceed it.
    vmem_need = (2 * 4 * tile_b * (obs_dim + out_features)
                 + 4 * tile_b * (h1_dim + h2_dim) + param_bytes)
    compiler_kwargs = dict(dimension_semantics=("parallel",))
    if vmem_need > 12 * 1024 * 1024:
        compiler_kwargs["vmem_limit_bytes"] = min(vmem_need + (4 << 20), 64 << 20)

    # Weights / biases: full-array blocks with constant index maps -> DMA'd once and
    # VMEM-resident across every batch tile (no per-step re-fetch).
    resident = lambda arr: pl.BlockSpec(arr.shape, lambda i: (0, 0))

    logits = pl.pallas_call(
        _policy_mlp_kernel,
        out_shape=jax.ShapeDtypeStruct((B, out_features), jnp.float32),
        grid=grid,
        in_specs=[
            pl.BlockSpec((tile_b, obs_dim), lambda i: (i, 0)),
            resident(w1), resident(b1),
            resident(w2), resident(b2),
            resident(w3), resident(b3),
        ],
        out_specs=pl.BlockSpec((tile_b, out_features), lambda i: (i, 0)),
        compiler_params=pltpu.CompilerParams(**compiler_kwargs),
        cost_estimate=cost,
    )(obs, w1, b1, w2, b2, w3, b3)

    # Pure layout glue; fuses with the pallas_call under jit (no extra HBM pass).
    return logits.reshape(B, act_dim, act_num_per_dim)


def init_params(key, obs_dim, hidden_sizes, act_num_total):
    """Deterministic PyTorch-Linear-style init: U(-1/sqrt(fan_in), 1/sqrt(fan_in))."""
    sizes = [obs_dim] + list(hidden_sizes) + [act_num_total]
    params = []
    for j in range(len(sizes) - 1):
        fan_in, fan_out = sizes[j], sizes[j + 1]
        key, kw, kb = jax.random.split(key, 3)
        bound = 1.0 / jnp.sqrt(jnp.float32(fan_in))
        w = jax.random.uniform(kw, (fan_in, fan_out), jnp.float32, -bound, bound)
        b = jax.random.uniform(kb, (1, fan_out), jnp.float32, -bound, bound)
        params += [w, b]
    return params


if __name__ == "__main__":
    # Module config (small, consistent with the forward):
    obs_dim = 16
    hidden_sizes = (32, 32)
    act_shape = (8, 8, 8)           # multi-discrete: 3 dims, 8 choices each (uniform)
    act_num_total = sum(act_shape)  # 24
    act_num_per_dim = act_shape[0]  # 8
    act_dim = len(act_shape)        # 3
    batch = 2

    key = jax.random.PRNGKey(0)
    key, kobs = jax.random.split(key)
    obs = jax.random.normal(kobs, (batch, obs_dim), jnp.float32)
    params = init_params(key, obs_dim, hidden_sizes, act_num_total)

    # Jit the whole wrapper so the reshape fuses with the pallas_call.
    forward = jax.jit(
        stocha_policy_multi_dis_forward,
        static_argnames=("act_dim", "act_num_per_dim", "max_tile_b"))

    logits = forward(obs, params, act_dim=act_dim, act_num_per_dim=act_num_per_dim)
    logits = jax.block_until_ready(logits)

    assert logits.shape == (batch, act_dim, act_num_per_dim), logits.shape
    assert logits.dtype == jnp.float32

    # Sanity check against a plain-JAX reference of the same math.
    w1, b1, w2, b2, w3, b3 = params
    ref = jnp.maximum(obs @ w1 + b1, 0.0)
    ref = jnp.maximum(ref @ w2 + b2, 0.0)
    ref = (ref @ w3 + b3).reshape(batch, act_dim, act_num_per_dim)
    assert jnp.allclose(logits, ref, atol=1e-5, rtol=1e-5)

    print("KERNEL_OK")
</pallas_src>

<mosaic_0001>
module attributes {stable_mosaic.version = 11 : i64} {
  func.func @_policy_mlp_kernel(%arg0: i32, %arg1: memref<8x16xf32, #tpu.memory_space<vmem>>, %arg2: memref<16x32xf32, #tpu.memory_space<vmem>>, %arg3: memref<1x32xf32, #tpu.memory_space<vmem>>, %arg4: memref<32x32xf32, #tpu.memory_space<vmem>>, %arg5: memref<1x32xf32, #tpu.memory_space<vmem>>, %arg6: memref<32x24xf32, #tpu.memory_space<vmem>>, %arg7: memref<1x24xf32, #tpu.memory_space<vmem>>, %arg8: memref<8x24xf32, #tpu.memory_space<vmem>>) attributes {dimension_semantics = [#tpu.dimension_semantics<parallel>], iteration_bounds = array<i64: 1>, scalar_prefetch = 0 : i64, scratch_operands = 0 : i64, tpu.core_type = #tpu.core_type<tc>, window_params = [{transform_indices = @transform_0, window_bounds = array<i64: 8, 16>}, {pipeline_mode = #tpu.pipeline_mode<synchronous>, transform_indices = @transform_1, window_bounds = array<i64: 16, 32>}, {pipeline_mode = #tpu.pipeline_mode<synchronous>, transform_indices = @transform_2, window_bounds = array<i64: 1, 32>}, {pipeline_mode = #tpu.pipeline_mode<synchronous>, transform_indices = @transform_3, window_bounds = array<i64: 32, 32>}, {pipeline_mode = #tpu.pipeline_mode<synchronous>, transform_indices = @transform_4, window_bounds = array<i64: 1, 32>}, {pipeline_mode = #tpu.pipeline_mode<synchronous>, transform_indices = @transform_5, window_bounds = array<i64: 32, 24>}, {pipeline_mode = #tpu.pipeline_mode<synchronous>, transform_indices = @transform_6, window_bounds = array<i64: 1, 24>}, {transform_indices = @transform_7, window_bounds = array<i64: 8, 24>}]} {
    %c0 = arith.constant 0 : index
    %c0_0 = arith.constant 0 : index
    %0 = vector.load %arg1[%c0, %c0_0] : memref<8x16xf32, #tpu.memory_space<vmem>>, vector<8x16xf32>
    %c0_1 = arith.constant 0 : index
    %c0_2 = arith.constant 0 : index
    %1 = vector.load %arg2[%c0_1, %c0_2] : memref<16x32xf32, #tpu.memory_space<vmem>>, vector<16x32xf32>
    %cst = arith.constant dense<0.000000e+00> : vector<8x32xf32>
    %2 = tpu.matmul %0, %1, %cst {dimension_numbers = #tpu.dot_dimension_numbers<[1], [0], [0], [1], [0, 0, 1, 1], [], []>} : vector<8x16xf32>, vector<16x32xf32>, vector<8x32xf32> -> vector<8x32xf32>
    %c0_3 = arith.constant 0 : index
    %c0_4 = arith.constant 0 : index
    %3 = vector.load %arg3[%c0_3, %c0_4] : memref<1x32xf32, #tpu.memory_space<vmem>>, vector<1x32xf32>
    %4 = vector.broadcast %3 : vector<1x32xf32> to vector<8x32xf32>
    %5 = arith.addf %2, %4 : vector<8x32xf32>
    %cst_5 = arith.constant 0.000000e+00 : f32
    %6 = vector.broadcast %cst_5 : f32 to vector<8x32xf32>
    %7 = arith.maximumf %5, %6 : vector<8x32xf32>
    %c0_6 = arith.constant 0 : index
    %c0_7 = arith.constant 0 : index
    %8 = vector.load %arg4[%c0_6, %c0_7] : memref<32x32xf32, #tpu.memory_space<vmem>>, vector<32x32xf32>
    %cst_8 = arith.constant dense<0.000000e+00> : vector<8x32xf32>
    %9 = tpu.matmul %7, %8, %cst_8 {dimension_numbers = #tpu.dot_dimension_numbers<[1], [0], [0], [1], [0, 0, 1, 1], [], []>} : vector<8x32xf32>, vector<32x32xf32>, vector<8x32xf32> -> vector<8x32xf32>
    %c0_9 = arith.constant 0 : index
    %c0_10 = arith.constant 0 : index
    %10 = vector.load %arg5[%c0_9, %c0_10] : memref<1x32xf32, #tpu.memory_space<vmem>>, vector<1x32xf32>
    %11 = vector.broadcast %10 : vector<1x32xf32> to vector<8x32xf32>
    %12 = arith.addf %9, %11 : vector<8x32xf32>
    %cst_11 = arith.constant 0.000000e+00 : f32
    %13 = vector.broadcast %cst_11 : f32 to vector<8x32xf32>
    %14 = arith.maximumf %12, %13 : vector<8x32xf32>
    %c0_12 = arith.constant 0 : index
    %c0_13 = arith.constant 0 : index
    %15 = vector.load %arg6[%c0_12, %c0_13] : memref<32x24xf32, #tpu.memory_space<vmem>>, vector<32x24xf32>
    %cst_14 = arith.constant dense<0.000000e+00> : vector<8x24xf32>
    %16 = tpu.matmul %14, %15, %cst_14 {dimension_numbers = #tpu.dot_dimension_numbers<[1], [0], [0], [1], [0, 0, 1, 1], [], []>} : vector<8x32xf32>, vector<32x24xf32>, vector<8x24xf32> -> vector<8x24xf32>
    %c0_15 = arith.constant 0 : index
    %c0_16 = arith.constant 0 : index
    %17 = vector.load %arg7[%c0_15, %c0_16] : memref<1x24xf32, #tpu.memory_space<vmem>>, vector<1x24xf32>
    %18 = vector.broadcast %17 : vector<1x24xf32> to vector<8x24xf32>
    %19 = arith.addf %16, %18 : vector<8x24xf32>
    %c0_17 = arith.constant 0 : index
    %c0_18 = arith.constant 0 : index
    %20 = vector.load %arg8[%c0_17, %c0_18] : memref<8x24xf32, #tpu.memory_space<vmem>>, vector<8x24xf32>
    tpu.vector_store %arg8[%c0_17, %c0_18], %19 {strides = array<i32>} : memref<8x24xf32, #tpu.memory_space<vmem>>, vector<8x24xf32>,
    return
  }
  func.func @transform_0(%arg0: i32) -> (i32, i32) {
    %c0_i32 = arith.constant 0 : i32
    %c0_i32_0 = arith.constant 0 : i32
    return %arg0, %c0_i32 : i32, i32
  }
  func.func @transform_1(%arg0: i32) -> (i32, i32) {
    %c0_i32 = arith.constant 0 : i32
    %c0_i32_0 = arith.constant 0 : i32
    %c0_i32_1 = arith.constant 0 : i32
    return %c0_i32, %c0_i32_0 : i32, i32
  }
  func.func @transform_2(%arg0: i32) -> (i32, i32) {
    %c0_i32 = arith.constant 0 : i32
    %c0_i32_0 = arith.constant 0 : i32
    %c0_i32_1 = arith.constant 0 : i32
    return %c0_i32, %c0_i32_0 : i32, i32
  }
  func.func @transform_3(%arg0: i32) -> (i32, i32) {
    %c0_i32 = arith.constant 0 : i32
    %c0_i32_0 = arith.constant 0 : i32
    %c0_i32_1 = arith.constant 0 : i32
    return %c0_i32, %c0_i32_0 : i32, i32
  }
  func.func @transform_4(%arg0: i32) -> (i32, i32) {
    %c0_i32 = arith.constant 0 : i32
    %c0_i32_0 = arith.constant 0 : i32
    %c0_i32_1 = arith.constant 0 : i32
    return %c0_i32, %c0_i32_0 : i32, i32
  }
  func.func @transform_5(%arg0: i32) -> (i32, i32) {
    %c0_i32 = arith.constant 0 : i32
    %c0_i32_0 = arith.constant 0 : i32
    %c0_i32_1 = arith.constant 0 : i32
    return %c0_i32, %c0_i32_0 : i32, i32
  }
  func.func @transform_6(%arg0: i32) -> (i32, i32) {
    %c0_i32 = arith.constant 0 : i32
    %c0_i32_0 = arith.constant 0 : i32
    %c0_i32_1 = arith.constant 0 : i32
    return %c0_i32, %c0_i32_0 : i32, i32
  }
  func.func @transform_7(%arg0: i32) -> (i32, i32) {
    %c0_i32 = arith.constant 0 : i32
    %c0_i32_0 = arith.constant 0 : i32
    return %arg0, %c0_i32 : i32, i32
  }
}

</mosaic_0001>

<bundles_post_ra>
// kernel: stocha_policy_multi_dis_forward.1
= control target key start
LH: loop header
LB: loop body
LE: loop exit
PB: predicated region body
PF: predicated region fallthrough
CT: control target
= control target key end

     0   :  { %v388_v2 = vmov 0.0|0.0   ;;  %vm389_vm0 = vmmov 0   ;;  %v390_v4 = vmov 0.0   ;;  %vm36_vm1 = vcmask 130048   ;;  %s476_s0 = inlined_call_operand.vmem [shape: f32[2,16], index: 0, kind: input, shape index: {}]   ;;  %s477_s1 = inlined_call_operand.vmem [shape: f32[16,32], index: 1, kind: input, shape index: {}]   ;;  %s478_s2 = inlined_call_operand.vmem [shape: f32[1,32], index: 2, kind: input, shape index: {}]   ;;  %s479_s3 = inlined_call_operand.vmem [shape: f32[32,32], index: 3, kind: input, shape index: {}]   ;;  %s480_s4 = inlined_call_operand.vmem [shape: f32[1,32], index: 4, kind: input, shape index: {}]   ;;  %s481_s5 = inlined_call_operand.vmem [shape: f32[32,24], index: 5, kind: input, shape index: {}]   ;;  %s482_s6 = inlined_call_operand.vmem [shape: f32[1,24], index: 6, kind: input, shape index: {}]   ;;  %s483_s7 = inlined_call_operand.vmem [shape: f32[2,24], index: 7, kind: output, shape index: {}]  }
   0x1   :  { %v27_v0 = vld [vmem:[%s477_s1] sm:$0xff]  ;;  %v28_v1 = vld [vmem:[%s477_s1 + $0x8] sm:$0xff]  ;;  %370 = vmatprep.subr.bf16.mxu0 %v388_v2  ;;  %345 = vmatprep.mubr.msk.f32.mxu0 %vm389_vm0, %v390_v4  ;;  %v113_v9 = vld [vmem:[%s479_s3 + $0x10] sm:$0xff]  ;;  %vm122_vm2 = vcmask 261120   ;;  %vm281_vm3 = vcmask 195584  }
   0x2   :  { %v371_v3 = vpack.c.bf16 %v28_v1, %v27_v0  ;;  %v111_v5 = vld [vmem:[%s479_s3] sm:$0xff]  ;;  %v112_v6 = vld [vmem:[%s479_s3 + $0x8] sm:$0xff]  ;;  %373 = vmatprep.subr.bf16.mxu1 %v388_v2  ;;  %356 = vmatprep.mubr.msk.f32.mxu1 %vm389_vm0, %v390_v4  ;;  %v114_v10 = vld [vmem:[%s479_s3 + $0x18] sm:$0xff] }
   0x3   :  { %v374_v7 = vpack.c.bf16 %v112_v6, %v111_v5  ;;  %v26_v8 = vld [vmem:[%s476_s0] sm:$0xff]  ;;  %v377_v11 = vpack.c.bf16 %v114_v10, %v113_v9  ;;  %v198_v13 = vld [vmem:[%s481_s5 + $0x8] sm:$0xff]  ;;  %v199_v20 = vld [vmem:[%s481_s5 + $0x10] sm:$0xff] }
   0x4   :  { %372 = vmatpush3.bf16.msra.mxu0 %v371_v3  ;;  %v197_v12 = vld [vmem:[%s481_s5] sm:$0xff]  ;;  %v200_v21 = vld [vmem:[%s481_s5 + $0x18] sm:$0xff] }
   0x5   :  { %375 = vmatpush3.bf16.msra.mxu1 %v374_v7  ;;  %379 = vmatprep.subr.bf16.mxu0 %v388_v2  ;;  %v380_v14 = vpack.c.bf16 %v198_v13, %v197_v12  ;;  %v322_v15 = vld [vmem:[%s478_s2] ss:$0 sm:$0xff]  ;;  %v383_v22 = vpack.c.bf16 %v200_v21, %v199_v20 }
   0x6   :  { %376 = vmatprep.subr.bf16.mxu1 %v388_v2  ;;  %v324_v23 = vld [vmem:[%s480_s4] ss:$0 sm:$0xff] }
   0x7   :  { %346 = vmatmul.mubr.msk.f32.vlgmr.msra.gmra.mrb[0].mxu0 %vm36_vm1, %v26_v8  ;;  %v326_v28 = vld [vmem:[%s482_s6] ss:$0 sm:$0xff] }
   0x8   :  { %367 = vmatprep.mubr.msk.f32.mxu0 %vm389_vm0, %v390_v4  ;;  %381 = vmatpush3.bf16.msra.mxu0 %v380_v14 }
   0x9   :  { %378 = vmatpush3.bf16.msra.mxu1 %v377_v11  ;;  %382 = vmatprep.subr.bf16.mxu0 %v388_v2 }
   0xc   :  { %384 = vmatpush3.bf16.msra.mxu0 %v383_v22 }
  0xda   :  { %v106_v16 = vpop.f32.mrb[0].mxu0 }
  0xdb   :  { %v107_v17 = vadd.f32 %v322_v15, %v106_v16  ;;  %v347_v18 = vpop.f32.mrb[1].mxu0 }
  0xdd   :  { %v110_v19 = vmax.f32 %v107_v17, 0.0 }
  0xdf   :  { %357 = vmatmul.mubr.msk.f32.vlgmr.msra.gmra.mrb[0].mxu1 %vm122_vm2, %v110_v19 }
 0x1b2   :  { %v192_v24 = vpop.f32.mrb[0].mxu1 }
 0x1b3   :  { %v193_v25 = vadd.f32 %v324_v23, %v192_v24  ;;  %v358_v26 = vpop.f32.mrb[1].mxu1 }
 0x1b5   :  { %v196_v27 = vmax.f32 %v193_v25, 0.0 }
 0x1b7   :  { %368 = vmatmul.mubr.msk.f32.vlgmr.msra.gmra.mrb[2].mxu0 %vm122_vm2, %v196_v27 }
 0x28a   :  { %v277_v29 = vpop.f32.mrb[2].mxu0 }
 0x28b   :  { %v278_v30 = vadd.f32 %v326_v28, %v277_v29  ;;  %v369_v31 = vpop.f32.mrb[3].mxu0 }
 0x28d   :  { %282 = vst.msk [vmem:[#allocation2] sm:$0xff] %vm281_vm3, %v278_v30 }
 0x294   :  { %v300_v32 = vld [vmem:[#allocation2] sm:$0x3] }
 0x295   :  { %301 = vst [vmem:[%s483_s7] sm:$0x3] %v300_v32 }

</bundles_post_ra>
